<compile_context>
chip_gen: v7x
topology: tpu7x:2x2x1
jax: 0.10.0
libtpu: 0.0.40
codegen_flags: <defaults>
</compile_context>

<pallas_src>
import functools

import jax
import jax.numpy as jnp
from jax.experimental import pallas as pl
from jax.experimental.pallas import tpu as pltpu  # noqa: F401  (kept per conventions)

BN_EPS = 1e-5
CPAD = 128          # lane-dense padded class dim (must be > class_num)


# ----------------------------------------------------------------------------
# Single fused kernel (no grid, everything VMEM-resident):
#   ids_ref  (T*BP, 4) int32 : col0 fwd ids (time-major), col1 reverse-time ids,
#                              col2 labels (rows 0..B-1), col3 unused
#   utab_ref (2V, 2H)  f32   : block_diag(emb@Wih_f + b_f, emb@Wih_b + b_b)
#   whh_ref  (2H, 2H)  f32   : block_diag(W_hh_f, W_hh_b)
#   head_ref (2H+8, CPAD)    : rows 0:2H = gamma-scaled W_out (lane-padded),
#                              row 2H   = beta@W_out + b_out
#   out_ref  (BP, CPAD) f32  : lanes [0,C) = logits, lane C = scalar loss
# ----------------------------------------------------------------------------
def tc_kernel(ids_ref, utab_ref, whh_ref, head_ref, out_ref, *, batch, classes):
    TBP = ids_ref.shape[0]                  # T * BP
    BP, cpad = out_ref.shape
    T = TBP // BP
    V2 = utab_ref.shape[0]                  # 2 * vocab
    V = V2 // 2
    H2 = whh_ref.shape[0]                   # 2 * hidden

    # ---- fused embedding gather + input projection (one MXU matmul) ----------
    # Each two-hot row selects table row ids_f (lanes 0:H of utab) and table row
    # V + ids_r (lanes H:2H), so u2 row-block t is already [u_f(t) | u_b(T-1-t)].
    ids_f = ids_ref[:, 0:1]
    ids_r = ids_ref[:, 1:2]
    lane_v = jax.lax.broadcasted_iota(jnp.int32, (TBP, V2), 1)
    oh2 = ((lane_v == ids_f) | (lane_v - V == ids_r)).astype(jnp.float32)
    u2 = jnp.dot(oh2, utab_ref[...], preferred_element_type=jnp.float32)   # (T*BP, 2H)

    # ---- serial bidirectional recurrence, fully unrolled ---------------------
    # Both directions run in one MXU op per step via the block-diag Whh acting
    # on the packed state h = [h_fwd | h_bwd]; u2 slices are whole-tile (BP=8
    # rows) static slices of a register-resident value -> no per-step lane ops.
    whh = whh_ref[...]                                                     # (2H, 2H)
    h = jnp.tanh(u2[0:BP, :])               # h0 == 0 -> skip h @ Whh at t = 0
    for t in range(1, T):
        h = jnp.tanh(u2[t * BP:(t + 1) * BP, :]
                     + jnp.dot(h, whh, preferred_element_type=jnp.float32))
    # h == [h_fwd_final | h_bwd_final] == h_n.permute(1,0,2).reshape(B, 2H)
    # (rows >= batch are padding and are masked below / sliced away in wrapper)

    # ---- BatchNorm1d (training-mode batch stats over the real `batch` rows) ---
    row = jax.lax.broadcasted_iota(jnp.int32, (BP, 1), 0)
    rmask = (row < batch).astype(jnp.float32)
    inv_b = jnp.float32(1.0 / batch)
    mean = jnp.sum(h * rmask, axis=0, keepdims=True) * inv_b
    cen = h - mean
    var = jnp.sum(cen * cen * rmask, axis=0, keepdims=True) * inv_b        # biased
    hn = cen * jax.lax.rsqrt(var + BN_EPS)
    # (gamma / beta are folded into `head` at param-prep time — exact algebra.)

    # ---- Linear -> lane-padded logits ----------------------------------------
    w = head_ref[0:H2, :]
    b = head_ref[H2:H2 + 1, :]
    logits = jnp.dot(hn, w, preferred_element_type=jnp.float32) + b        # (BP, CPAD)

    # ---- softmax cross entropy over the real class lanes / real batch rows ---
    lane = jax.lax.broadcasted_iota(jnp.int32, (BP, cpad), 1)
    z = jnp.where(lane < classes, logits, jnp.float32(-1e30))
    m = jnp.max(z, axis=1, keepdims=True)
    lse = m + jnp.log(jnp.sum(jnp.exp(z - m), axis=1, keepdims=True))
    lab = ids_ref[0:BP, 2:3]                 # labels (pad rows hold 0, masked out)
    picked = jnp.sum(jnp.where(lane == lab, logits, 0.0), axis=1, keepdims=True)
    nll = lse - picked                                                     # (BP, 1)
    loss = jnp.sum(nll * rmask, keepdims=True) * inv_b                     # (1, 1)

    # ---- single lane-dense store: logits in lanes [0,C), loss in lane C ------
    out_ref[...] = jnp.where(lane == classes, loss, logits)


# ----------------------------------------------------------------------------
# One-time parameter packing (call ONCE, outside the per-step forward).
# ----------------------------------------------------------------------------
def prepare_params(params, *, cpad=CPAD):
    emb = params["embedding"]                                  # (V, E)
    V = emb.shape[0]
    H = params["w_ih"].shape[2]
    C = params["w_out"].shape[1]
    assert C + 1 <= cpad

    # fold embedding lookup + input projection + rnn bias, per direction
    tab_f = emb @ params["w_ih"][0] + params["b_rnn"][0]       # (V, H)
    tab_b = emb @ params["w_ih"][1] + params["b_rnn"][1]       # (V, H)
    zv = jnp.zeros((V, H), jnp.float32)
    utab = jnp.concatenate(
        [jnp.concatenate([tab_f, zv], axis=1),
         jnp.concatenate([zv, tab_b], axis=1)], axis=0)        # (2V, 2H)

    zh = jnp.zeros((H, H), jnp.float32)
    whh = jnp.concatenate(
        [jnp.concatenate([params["w_hh"][0], zh], axis=1),
         jnp.concatenate([zh, params["w_hh"][1]], axis=1)], axis=0)  # (2H, 2H)

    # fold BatchNorm affine into the output layer (exact algebra):
    #   (xhat*gamma + beta) @ W + b == xhat @ (gamma[:,None]*W) + (beta @ W + b)
    wp = params["gamma"][:, None] * params["w_out"]            # (2H, C)
    bp = params["beta"] @ params["w_out"] + params["b_out"]    # (C,)
    head = jnp.zeros((2 * H + 8, cpad), jnp.float32)
    head = head.at[0:2 * H, 0:C].set(wp)
    head = head.at[2 * H, 0:C].set(bp)

    return dict(utab=utab, whh=whh, head=head)


# ----------------------------------------------------------------------------
# Glue: full TC.forward  (only tiny int32 id repacking happens per call)
# ----------------------------------------------------------------------------
def tc_forward(packed, input_ids, labels, *, num_classes):
    ids = input_ids.astype(jnp.int32)                          # (B, T)
    B, T = ids.shape
    BP = ((B + 7) // 8) * 8                                    # pad batch to sublane tile
    pad = BP - B

    ids_tm = jnp.pad(jnp.transpose(ids), ((0, 0), (0, pad)))   # (T, BP) time-major
    ids_f = ids_tm.reshape(T * BP)
    ids_r = ids_tm[::-1].reshape(T * BP)                       # reverse-time order
    lab = jnp.pad(labels.astype(jnp.int32), (0, T * BP - B))   # labels in block t=0
    ids_lab = jnp.stack([ids_f, ids_r, lab, jnp.zeros_like(ids_f)], axis=1)  # (T*BP, 4)

    cpad = packed["head"].shape[1]
    out = pl.pallas_call(
        functools.partial(tc_kernel, batch=B, classes=num_classes),
        out_shape=jax.ShapeDtypeStruct((BP, cpad), jnp.float32),
    )(ids_lab, packed["utab"], packed["whh"], packed["head"])

    logits = out[:B, :num_classes]
    loss = out[0, num_classes]
    return loss, logits


# ----------------------------------------------------------------------------
# Deterministic synthetic parameters (shapes match nn.Embedding / nn.RNN(bi) /
# nn.BatchNorm1d / nn.Linear at init).
# ----------------------------------------------------------------------------
def init_params(key, vocab, E, H, C):
    ks = jax.random.split(key, 6)
    n = lambda k, shape, scale: jax.random.normal(k, shape, jnp.float32) * scale
    return dict(
        embedding=n(ks[0], (vocab, E), 0.1),
        w_ih=n(ks[1], (2, E, H), 1.0 / jnp.sqrt(E)),      # (dir, in, out)
        w_hh=n(ks[2], (2, H, H), 1.0 / jnp.sqrt(H)),      # (dir, in, out)
        b_rnn=n(ks[3], (2, 1, H), 0.1),                   # b_ih + b_hh folded
        gamma=jnp.ones((2 * H,), jnp.float32),            # BatchNorm1d weight init
        beta=jnp.zeros((2 * H,), jnp.float32),            # BatchNorm1d bias init
        w_out=n(ks[4], (2 * H, C), 1.0 / jnp.sqrt(2 * H)),
        b_out=n(ks[5], (C,), 0.1),
    )


# ----------------------------------------------------------------------------
# Pure-JAX reference for validation
# ----------------------------------------------------------------------------
def ref_forward(params, input_ids, labels):
    emb = params["embedding"][input_ids]
    x = jnp.transpose(emb, (1, 0, 2))                     # (T, B, E)
    B, H = input_ids.shape[0], params["w_ih"].shape[2]

    def make_step(d):
        def step(h, xt):
            h_new = jnp.tanh(xt @ params["w_ih"][d] + h @ params["w_hh"][d]
                             + params["b_rnn"][d])
            return h_new, None
        return step

    h0 = jnp.zeros((B, H), jnp.float32)
    hf, _ = jax.lax.scan(make_step(0), h0, x)
    hb, _ = jax.lax.scan(make_step(1), h0, x[::-1])
    h_out = jnp.stack([hf, hb], axis=0)
    h_cat = jnp.transpose(h_out, (1, 0, 2)).reshape(B, 2 * H)
    mean = h_cat.mean(0, keepdims=True)
    var = ((h_cat - mean) ** 2).mean(0, keepdims=True)
    hn = (h_cat - mean) / jnp.sqrt(var + BN_EPS) * params["gamma"] + params["beta"]
    logits = hn @ params["w_out"] + params["b_out"]
    lse = jax.scipy.special.logsumexp(logits, axis=1)
    nll = lse - logits[jnp.arange(B), labels]
    return nll.mean(), logits


if __name__ == "__main__":
    VOCAB, E, H, C = 50, 16, 32, 4     # vocab_size, embed_size, hidden_dim, class_num
    B, T = 4, 8                        # batch, seq_len   (num_layers=1, dropout=0.0)

    key = jax.random.PRNGKey(0)
    kp, ki, kl = jax.random.split(key, 3)
    params = init_params(kp, VOCAB, E, H, C)
    input_ids = jax.random.randint(ki, (B, T), 0, VOCAB, dtype=jnp.int32)
    labels = jax.random.randint(kl, (B,), 0, C, dtype=jnp.int32)

    packed = prepare_params(params)                        # one-time weight packing
    fwd = jax.jit(functools.partial(tc_forward, num_classes=C))
    loss, logits = fwd(packed, input_ids, labels)
    jax.block_until_ready((loss, logits))

    ref_loss, ref_logits = ref_forward(params, input_ids, labels)
    assert logits.shape == (B, C) and loss.shape == ()
    assert jnp.allclose(logits, ref_logits, atol=1e-3, rtol=1e-3)
    assert jnp.allclose(loss, ref_loss, atol=1e-3, rtol=1e-3)
    print("KERNEL_OK")
</pallas_src>

<mosaic_0001>
module attributes {stable_mosaic.version = 11 : i64} {
  func.func @tc_kernel(%arg0: memref<64x4xi32, #tpu.memory_space<vmem>>, %arg1: memref<100x64xf32, #tpu.memory_space<vmem>>, %arg2: memref<64x64xf32, #tpu.memory_space<vmem>>, %arg3: memref<72x128xf32, #tpu.memory_space<vmem>>, %arg4: memref<8x128xf32, #tpu.memory_space<vmem>>) attributes {dimension_semantics = [], scalar_prefetch = 0 : i64, scratch_operands = 0 : i64, tpu.core_type = #tpu.core_type<tc>} {
    %c0 = arith.constant 0 : index
    %c0_0 = arith.constant 0 : index
    %0 = vector.load %arg0[%c0, %c0_0] : memref<64x4xi32, #tpu.memory_space<vmem>>, vector<64x1xi32>
    %c0_1 = arith.constant 0 : index
    %c1 = arith.constant 1 : index
    %1 = vector.load %arg0[%c0_1, %c1] : memref<64x4xi32, #tpu.memory_space<vmem>>, vector<64x1xi32>
    %2 = tpu.iota {dimensions = array<i32: 1>} : vector<64x100xi32>
    %3 = vector.broadcast %0 : vector<64x1xi32> to vector<64x100xi32>
    %4 = arith.cmpi eq, %2, %3 : vector<64x100xi32>
    %c50_i32 = arith.constant 50 : i32
    %5 = vector.broadcast %c50_i32 : i32 to vector<64x100xi32>
    %6 = arith.subi %2, %5 : vector<64x100xi32>
    %7 = vector.broadcast %1 : vector<64x1xi32> to vector<64x100xi32>
    %8 = arith.cmpi eq, %6, %7 : vector<64x100xi32>
    %9 = arith.ori %4, %8 : vector<64x100xi1>
    %10 = arith.extui %9 : vector<64x100xi1> to vector<64x100xi32>
    %11 = arith.sitofp %10 : vector<64x100xi32> to vector<64x100xf32>
    %c0_2 = arith.constant 0 : index
    %c0_3 = arith.constant 0 : index
    %12 = vector.load %arg1[%c0_2, %c0_3] : memref<100x64xf32, #tpu.memory_space<vmem>>, vector<100x64xf32>
    %cst = arith.constant dense<0.000000e+00> : vector<64x64xf32>
    %13 = tpu.matmul %11, %12, %cst {dimension_numbers = #tpu.dot_dimension_numbers<[1], [0], [0], [1], [0, 0, 1, 1], [], []>} : vector<64x100xf32>, vector<100x64xf32>, vector<64x64xf32> -> vector<64x64xf32>
    %c0_4 = arith.constant 0 : index
    %c0_5 = arith.constant 0 : index
    %14 = vector.load %arg2[%c0_4, %c0_5] : memref<64x64xf32, #tpu.memory_space<vmem>>, vector<64x64xf32>
    %15 = vector.extract_strided_slice %13 {offsets = [0, 0], sizes = [8, 64], strides = [1, 1]} : vector<64x64xf32> to vector<8x64xf32>
    %16 = math.tanh %15 : vector<8x64xf32>
    %17 = vector.extract_strided_slice %13 {offsets = [8, 0], sizes = [8, 64], strides = [1, 1]} : vector<64x64xf32> to vector<8x64xf32>
    %cst_6 = arith.constant dense<0.000000e+00> : vector<8x64xf32>
    %18 = tpu.matmul %16, %14, %cst_6 {dimension_numbers = #tpu.dot_dimension_numbers<[1], [0], [0], [1], [0, 0, 1, 1], [], []>} : vector<8x64xf32>, vector<64x64xf32>, vector<8x64xf32> -> vector<8x64xf32>
    %19 = arith.addf %17, %18 : vector<8x64xf32>
    %20 = math.tanh %19 : vector<8x64xf32>
    %21 = vector.extract_strided_slice %13 {offsets = [16, 0], sizes = [8, 64], strides = [1, 1]} : vector<64x64xf32> to vector<8x64xf32>
    %cst_7 = arith.constant dense<0.000000e+00> : vector<8x64xf32>
    %22 = tpu.matmul %20, %14, %cst_7 {dimension_numbers = #tpu.dot_dimension_numbers<[1], [0], [0], [1], [0, 0, 1, 1], [], []>} : vector<8x64xf32>, vector<64x64xf32>, vector<8x64xf32> -> vector<8x64xf32>
    %23 = arith.addf %21, %22 : vector<8x64xf32>
    %24 = math.tanh %23 : vector<8x64xf32>
    %25 = vector.extract_strided_slice %13 {offsets = [24, 0], sizes = [8, 64], strides = [1, 1]} : vector<64x64xf32> to vector<8x64xf32>
    %cst_8 = arith.constant dense<0.000000e+00> : vector<8x64xf32>
    %26 = tpu.matmul %24, %14, %cst_8 {dimension_numbers = #tpu.dot_dimension_numbers<[1], [0], [0], [1], [0, 0, 1, 1], [], []>} : vector<8x64xf32>, vector<64x64xf32>, vector<8x64xf32> -> vector<8x64xf32>
    %27 = arith.addf %25, %26 : vector<8x64xf32>
    %28 = math.tanh %27 : vector<8x64xf32>
    %29 = vector.extract_strided_slice %13 {offsets = [32, 0], sizes = [8, 64], strides = [1, 1]} : vector<64x64xf32> to vector<8x64xf32>
    %cst_9 = arith.constant dense<0.000000e+00> : vector<8x64xf32>
    %30 = tpu.matmul %28, %14, %cst_9 {dimension_numbers = #tpu.dot_dimension_numbers<[1], [0], [0], [1], [0, 0, 1, 1], [], []>} : vector<8x64xf32>, vector<64x64xf32>, vector<8x64xf32> -> vector<8x64xf32>
    %31 = arith.addf %29, %30 : vector<8x64xf32>
    %32 = math.tanh %31 : vector<8x64xf32>
    %33 = vector.extract_strided_slice %13 {offsets = [40, 0], sizes = [8, 64], strides = [1, 1]} : vector<64x64xf32> to vector<8x64xf32>
    %cst_10 = arith.constant dense<0.000000e+00> : vector<8x64xf32>
    %34 = tpu.matmul %32, %14, %cst_10 {dimension_numbers = #tpu.dot_dimension_numbers<[1], [0], [0], [1], [0, 0, 1, 1], [], []>} : vector<8x64xf32>, vector<64x64xf32>, vector<8x64xf32> -> vector<8x64xf32>
    %35 = arith.addf %33, %34 : vector<8x64xf32>
    %36 = math.tanh %35 : vector<8x64xf32>
    %37 = vector.extract_strided_slice %13 {offsets = [48, 0], sizes = [8, 64], strides = [1, 1]} : vector<64x64xf32> to vector<8x64xf32>
    %cst_11 = arith.constant dense<0.000000e+00> : vector<8x64xf32>
    %38 = tpu.matmul %36, %14, %cst_11 {dimension_numbers = #tpu.dot_dimension_numbers<[1], [0], [0], [1], [0, 0, 1, 1], [], []>} : vector<8x64xf32>, vector<64x64xf32>, vector<8x64xf32> -> vector<8x64xf32>
    %39 = arith.addf %37, %38 : vector<8x64xf32>
    %40 = math.tanh %39 : vector<8x64xf32>
    %41 = vector.extract_strided_slice %13 {offsets = [56, 0], sizes = [8, 64], strides = [1, 1]} : vector<64x64xf32> to vector<8x64xf32>
    %cst_12 = arith.constant dense<0.000000e+00> : vector<8x64xf32>
    %42 = tpu.matmul %40, %14, %cst_12 {dimension_numbers = #tpu.dot_dimension_numbers<[1], [0], [0], [1], [0, 0, 1, 1], [], []>} : vector<8x64xf32>, vector<64x64xf32>, vector<8x64xf32> -> vector<8x64xf32>
    %43 = arith.addf %41, %42 : vector<8x64xf32>
    %44 = math.tanh %43 : vector<8x64xf32>
    %45 = tpu.iota {dimensions = array<i32: 0>} : vector<8x1xi32>
    %c4_i32 = arith.constant 4 : i32
    %46 = vector.broadcast %c4_i32 : i32 to vector<8x1xi32>
    %47 = arith.cmpi slt, %45, %46 : vector<8x1xi32>
    %48 = arith.extui %47 : vector<8x1xi1> to vector<8x1xi32>
    %49 = arith.sitofp %48 : vector<8x1xi32> to vector<8x1xf32>
    %50 = vector.broadcast %49 : vector<8x1xf32> to vector<8x64xf32>
    %51 = arith.mulf %44, %50 : vector<8x64xf32>
    %cst_13 = arith.constant dense<0.000000e+00> : vector<64xf32>
    %52 = vector.multi_reduction <add>, %51, %cst_13 [0] : vector<8x64xf32> to vector<64xf32>
    %53 = vector.shape_cast %52 : vector<64xf32> to vector<1x64xf32>
    %cst_14 = arith.constant 2.500000e-01 : f32
    %54 = vector.broadcast %cst_14 : f32 to vector<1x64xf32>
    %55 = arith.mulf %53, %54 : vector<1x64xf32>
    %56 = vector.broadcast %55 : vector<1x64xf32> to vector<8x64xf32>
    %57 = arith.subf %44, %56 : vector<8x64xf32>
    %58 = arith.mulf %57, %57 : vector<8x64xf32>
    %59 = vector.broadcast %49 : vector<8x1xf32> to vector<8x64xf32>
    %60 = arith.mulf %58, %59 : vector<8x64xf32>
    %cst_15 = arith.constant dense<0.000000e+00> : vector<64xf32>
    %61 = vector.multi_reduction <add>, %60, %cst_15 [0] : vector<8x64xf32> to vector<64xf32>
    %62 = vector.shape_cast %61 : vector<64xf32> to vector<1x64xf32>
    %cst_16 = arith.constant 2.500000e-01 : f32
    %63 = vector.broadcast %cst_16 : f32 to vector<1x64xf32>
    %64 = arith.mulf %62, %63 : vector<1x64xf32>
    %cst_17 = arith.constant 9.99999974E-6 : f32
    %65 = vector.broadcast %cst_17 : f32 to vector<1x64xf32>
    %66 = arith.addf %64, %65 : vector<1x64xf32>
    %67 = math.rsqrt %66 : vector<1x64xf32>
    %68 = vector.broadcast %67 : vector<1x64xf32> to vector<8x64xf32>
    %69 = arith.mulf %57, %68 : vector<8x64xf32>
    %c0_18 = arith.constant 0 : index
    %c0_19 = arith.constant 0 : index
    %70 = vector.load %arg3[%c0_18, %c0_19] : memref<72x128xf32, #tpu.memory_space<vmem>>, vector<64x128xf32>
    %c64 = arith.constant 64 : index
    %c0_20 = arith.constant 0 : index
    %71 = vector.load %arg3[%c64, %c0_20] : memref<72x128xf32, #tpu.memory_space<vmem>>, vector<1x128xf32>
    %cst_21 = arith.constant dense<0.000000e+00> : vector<8x128xf32>
    %72 = tpu.matmul %69, %70, %cst_21 {dimension_numbers = #tpu.dot_dimension_numbers<[1], [0], [0], [1], [0, 0, 1, 1], [], []>} : vector<8x64xf32>, vector<64x128xf32>, vector<8x128xf32> -> vector<8x128xf32>
    %73 = vector.broadcast %71 : vector<1x128xf32> to vector<8x128xf32>
    %74 = arith.addf %72, %73 : vector<8x128xf32>
    %75 = tpu.iota {dimensions = array<i32: 1>} : vector<8x128xi32>
    %c4_i32_22 = arith.constant 4 : i32
    %76 = vector.broadcast %c4_i32_22 : i32 to vector<8x128xi32>
    %77 = arith.cmpi slt, %75, %76 : vector<8x128xi32>
    %cst_23 = arith.constant -1.000000e+30 : f32
    %78 = vector.broadcast %cst_23 : f32 to vector<8x128xf32>
    %79 = arith.select %77, %74, %78 : vector<8x128xi1>, vector<8x128xf32>
    %cst_24 = arith.constant dense<0xFF800000> : vector<8xf32>
    %80 = vector.multi_reduction <maximumf>, %79, %cst_24 [1] : vector<8x128xf32> to vector<8xf32>
    %81 = vector.shape_cast %80 : vector<8xf32> to vector<8x1xf32>
    %82 = vector.broadcast %81 : vector<8x1xf32> to vector<8x128xf32>
    %83 = arith.subf %79, %82 : vector<8x128xf32>
    %84 = math.exp %83 : vector<8x128xf32>
    %cst_25 = arith.constant dense<0.000000e+00> : vector<8xf32>
    %85 = vector.multi_reduction <add>, %84, %cst_25 [1] : vector<8x128xf32> to vector<8xf32>
    %86 = vector.shape_cast %85 : vector<8xf32> to vector<8x1xf32>
    %87 = math.log %86 : vector<8x1xf32>
    %88 = arith.addf %81, %87 : vector<8x1xf32>
    %c0_26 = arith.constant 0 : index
    %c2 = arith.constant 2 : index
    %89 = vector.load %arg0[%c0_26, %c2] : memref<64x4xi32, #tpu.memory_space<vmem>>, vector<8x1xi32>
    %90 = vector.broadcast %89 : vector<8x1xi32> to vector<8x128xi32>
    %91 = arith.cmpi eq, %75, %90 : vector<8x128xi32>
    %cst_27 = arith.constant 0.000000e+00 : f32
    %92 = vector.broadcast %cst_27 : f32 to vector<8x128xf32>
    %93 = arith.select %91, %74, %92 : vector<8x128xi1>, vector<8x128xf32>
    %cst_28 = arith.constant dense<0.000000e+00> : vector<8xf32>
    %94 = vector.multi_reduction <add>, %93, %cst_28 [1] : vector<8x128xf32> to vector<8xf32>
    %95 = vector.shape_cast %94 : vector<8xf32> to vector<8x1xf32>
    %96 = arith.subf %88, %95 : vector<8x1xf32>
    %97 = arith.mulf %96, %49 : vector<8x1xf32>
    %98 = vector.shape_cast %97 : vector<8x1xf32> to vector<1x8x1xf32>
    %cst_29 = arith.constant dense<0.000000e+00> : vector<1xf32>
    %99 = vector.multi_reduction <add>, %98, %cst_29 [1, 2] : vector<1x8x1xf32> to vector<1xf32>
    %100 = vector.shape_cast %99 : vector<1xf32> to vector<1x1x1xf32>
    %101 = vector.extract %100[0, 0, 0] : f32 from vector<1x1x1xf32>
    %102 = vector.broadcast %101 : f32 to vector<1x1xf32>
    %cst_30 = arith.constant 2.500000e-01 : f32
    %103 = vector.broadcast %cst_30 : f32 to vector<1x1xf32>
    %104 = arith.mulf %102, %103 : vector<1x1xf32>
    %c4_i32_31 = arith.constant 4 : i32
    %105 = vector.broadcast %c4_i32_31 : i32 to vector<8x128xi32>
    %106 = arith.cmpi eq, %75, %105 : vector<8x128xi32>
    %107 = vector.shape_cast %104 : vector<1x1xf32> to vector<1x1xf32>
    %108 = vector.broadcast %107 : vector<1x1xf32> to vector<8x128xf32>
    %109 = arith.select %106, %108, %74 : vector<8x128xi1>, vector<8x128xf32>
    %c0_32 = arith.constant 0 : index
    %c0_33 = arith.constant 0 : index
    %110 = vector.load %arg4[%c0_32, %c0_33] : memref<8x128xf32, #tpu.memory_space<vmem>>, vector<8x128xf32>
    tpu.vector_store %arg4[%c0_32, %c0_33], %109 {strides = array<i32>} : memref<8x128xf32, #tpu.memory_space<vmem>>, vector<8x128xf32>,
    return
  }
}

</mosaic_0001>

<bundles_post_ra>
// kernel: tc_forward.1
= control target key start
LH: loop header
LB: loop body
LE: loop exit
PB: predicated region body
PF: predicated region fallthrough
CT: control target
= control target key end

     0   :  { %v1421_v0 = vmov 0   ;;  %v1422_v8 = vmov 1   ;;  %vm154_vm0 = vcmask 1043456   ;;  %v1423_v29 = vmov 0.0|0.0   ;;  %s1710_s0 = inlined_call_operand.vmem [shape: s32[64,4], index: 0, kind: input, shape index: {}]   ;;  %s1711_s1 = inlined_call_operand.vmem [shape: f32[100,64], index: 1, kind: input, shape index: {}]   ;;  %s1712_s2 = inlined_call_operand.vmem [shape: f32[64,64], index: 2, kind: input, shape index: {}]   ;;  %s1713_s3 = inlined_call_operand.vmem [shape: f32[72,128], index: 3, kind: input, shape index: {}]   ;;  %s1714_s4 = inlined_call_operand.vmem [shape: f32[8,128], index: 4, kind: output, shape index: {}]  }
   0x1   :  { %1395 = vset.pattern.permute.xlu1 %v1421_v0  ;;  %1393 = vset.pattern.permute.xlu0 %v1421_v0  ;;  %v18_v1 = vld [vmem:[%s1710_s0 + $0x8] sm:$0xff]  ;;  %v1458_v2 = vld [vmem:[%s1710_s0] sm:$0xff]  ;;  %v118_v5 = vld [vmem:[%s1711_s1 + $0x10] sm:$0xff]  ;;  %v25_v33 = vlaneseq  ;;  %vm129_vm6 = vcmask 818176   ;;  %v1424_v40 = vmov 0.0  }
   0x2   :  { %31 = vperm.xlu1 %1395, %v18_v1   ;;  %28 = vperm.xlu0 %1393, %v1458_v2   ;;  %v116_v3 = vld [vmem:[%s1711_s1] sm:$0xff]  ;;  %v117_v4 = vld [vmem:[%s1711_s1 + $0x8] sm:$0xff]  ;;  %v119_v6 = vld [vmem:[%s1711_s1 + $0x18] sm:$0xff] }
   0x3   :  { %v1265_v7 = vpack.c.bf16 %v117_v4, %v116_v3  ;;  %v1269_v9 = vpack.c.bf16 %v119_v6, %v118_v5  ;;  %v120_v10 = vld [vmem:[%s1711_s1 + $0x20] sm:$0xff]  ;;  %v121_v11 = vld [vmem:[%s1711_s1 + $0x28] sm:$0xff]  ;;  %v19_v12 = vld [vmem:[%s1710_s0 + $0x10] sm:$0xff]  ;;  %1289 = vmatprep.subr.bf16.mxu1 %v1423_v29  ;;  %v1532_v34 = vand.u32 127, %v25_v33 }
   0x4   :  { %v1273_v13 = vpack.c.bf16 %v121_v11, %v120_v10  ;;  %v122_v14 = vld [vmem:[%s1711_s1 + $0x30] sm:$0xff]  ;;  %v123_v15 = vld [vmem:[%s1711_s1 + $0x38] sm:$0xff]  ;;  %v124_v18 = vld [vmem:[%s1711_s1 + $0x40] sm:$0xff] }
   0x5   :  { %1266 = vmatprep.subr.bf16.mxu0 %v1265_v7  ;;  %v20_v16 = vld [vmem:[%s1710_s0 + $0x18] sm:$0xff]  ;;  %v1277_v17 = vpack.c.bf16 %v123_v15, %v122_v14  ;;  %v125_v19 = vld [vmem:[%s1711_s1 + $0x48] sm:$0xff]  ;;  %v21_v20 = vld [vmem:[%s1710_s0 + $0x20] sm:$0xff]  ;;  %v954_v37 = vadd.s32 4294967246, %v1532_v34 }
   0x6   :  { %1396 = vset.pattern.permute.xlu1 %v1422_v8  ;;  %1394 = vset.pattern.permute.xlu0 %v1422_v8  ;;  %v1281_v21 = vpack.c.bf16 %v125_v19, %v124_v18  ;;  %v126_v22 = vld [vmem:[%s1711_s1 + $0x50] sm:$0xff]  ;;  %v127_v23 = vld [vmem:[%s1711_s1 + $0x58] sm:$0xff]  ;;  %v22_v24 = vld [vmem:[%s1710_s0 + $0x28] sm:$0xff] }
   0x7   :  { %64 = vperm.xlu1 %1396, %v18_v1   ;;  %61 = vperm.xlu0 %1394, %v1458_v2   ;;  %v1285_v25 = vpack.c.bf16 %v127_v23, %v126_v22  ;;  %v23_v26 = vld [vmem:[%s1710_s0 + $0x30] sm:$0xff]  ;;  %v128_v27 = vld [vmem:[%s1711_s1 + $0x60] sm:$0xf]  ;;  %v24_v28 = vld [vmem:[%s1710_s0 + $0x38] sm:$0xff] }
   0x8   :  { %1268 = vmatpush3.bf16.msra.mxu0 %v1265_v7  ;;  %v263_v30 = vld [vmem:[%s1712_s2] sm:$0xff]  ;;  %v264_v31 = vld [vmem:[%s1712_s2 + $0x8] sm:$0xff]  ;;  %v265_v61 = vld [vmem:[%s1712_s2 + $0x10] sm:$0xff] }
   0x9   :  { %1270 = vmatprep.subr.bf16.mxu0 %v1269_v9  ;;  %v1527_v32 = vpack.c.bf16 %v264_v31, %v263_v30  ;;  %v266_v62 = vld [vmem:[%s1712_s2 + $0x18] sm:$0xff]  ;;  %v268_v1 = vld [vmem:[%s1712_s2 + $0x28] sm:$0xff]  ;;  %v269_v4 = vld [vmem:[%s1712_s2 + $0x30] sm:$0xff] }
   0xa   :  { %v1567_v63 = vpack.c.bf16 %v266_v62, %v265_v61  ;;  %v270_v5 = vld [vmem:[%s1712_s2 + $0x38] sm:$0xff] }
   0xb   :  { %1397 = vset.pattern.permute.xlu1 %v1421_v0  ;;  %67 = vperm.xlu0 %1394, %v19_v12   ;;  %v267_v0 = vld [vmem:[%s1712_s2 + $0x20] sm:$0xff]  ;;  %v1591_v6 = vpack.c.bf16 %v270_v5, %v269_v4 }
   0xc   :  { %34 = vperm.xlu1 %1397, %v19_v12   ;;  %1272 = vmatpush3.bf16.msra.mxu0 %v1269_v9  ;;  %v1578_v3 = vpack.c.bf16 %v268_v1, %v267_v0 }
   0xd   :  { %1274 = vmatprep.subr.bf16.mxu0 %v1273_v13  ;;  %1291 = vmatpush3.bf16.msra.mxu1 %v1527_v32 }
   0xe   :  { %1292 = vmatprep.subr.bf16.mxu1 %v1423_v29 }
   0xf   :  { %70 = vperm.xlu0 %1394, %v20_v16  }
  0x10   :  { %37 = vperm.xlu1 %1397, %v20_v16   ;;  %1276 = vmatpush3.bf16.msra.mxu0 %v1273_v13 }
  0x11   :  { %1278 = vmatprep.subr.bf16.mxu0 %v1277_v17  ;;  %1294 = vmatpush3.bf16.msra.mxu1 %v1567_v63 }
  0x12   :  { %1295 = vmatprep.subr.bf16.mxu1 %v1423_v29 }
  0x13   :  { %73 = vperm.xlu0 %1394, %v21_v20  }
  0x14   :  { %40 = vperm.xlu1 %1397, %v21_v20   ;;  %1280 = vmatpush3.bf16.msra.mxu0 %v1277_v17 }
  0x15   :  { %1282 = vmatprep.subr.bf16.mxu0 %v1281_v21  ;;  %1297 = vmatpush3.bf16.msra.mxu1 %v1578_v3 }
  0x16   :  { %1298 = vmatprep.subr.bf16.mxu1 %v1423_v29 }
  0x17   :  { %76 = vperm.xlu0 %1394, %v22_v24  }
  0x18   :  { %43 = vperm.xlu1 %1397, %v22_v24   ;;  %1284 = vmatpush3.bf16.msra.mxu0 %v1281_v21 }
  0x19   :  { %1286 = vmatprep.subr.bf16.mxu0 %v1285_v25  ;;  %1300 = vmatpush3.bf16.msra.mxu1 %v1591_v6 }
  0x1a   :  { %1301 = vmatprep.subr.bf16.mxu1 %v1423_v29 }
  0x1b   :  { %79 = vperm.xlu0 %1394, %v23_v26  }
  0x1c   :  { %46 = vperm.xlu1 %1397, %v23_v26   ;;  %1288 = vmatpush3.bf16.msra.mxu0 %v1285_v25 }
  0x1d   :  { %1099 = vmatprep.subr.msk.mxu0 %vm154_vm0, %v128_v27 }
  0x1f   :  { %82 = vperm.xlu0 %1394, %v24_v28  }
  0x20   :  { %49 = vperm.xlu1 %1397, %v24_v28   ;;  %1100 = vmatpush3.msk.msra.mxu0 %vm154_vm0, %v128_v27 }
  0x21   :  { %1313 = vmatprep.subr.bf16.mxu0 %v1423_v29 }
  0x81   :  { %v29_v35 = vpop.permute.xlu0 %28  ;;  %v32_v36 = vpop.permute.xlu1 %31 }
  0x82   :  { %vm52_vm1 = vcmp.eq.s32.totalorder %v1532_v34, %v32_v36  ;;  %vm51_vm4 = vcmp.eq.s32.totalorder %v1532_v34, %v29_v35 }
  0x86   :  { %v65_v38 = vpop.permute.xlu1 %64  ;;  %v62_v39 = vpop.permute.xlu0 %61 }
  0x87   :  { %vm85_vm2 = vcmp.eq.s32.totalorder %v954_v37, %v65_v38  ;;  %vm84_vm3 = vcmp.eq.s32.totalorder %v954_v37, %v62_v39 }
  0x88   :  { %vm93_vm5 = vmor %vm52_vm1, %vm85_vm2 }
  0x89   :  { %v956_v41 = vsel %vm93_vm5, 1.0, %v1424_v40  ;;  %vm92_vm7 = vmor %vm51_vm4, %vm84_vm3 }
  0x8a   :  { %v955_v42 = vsel %vm92_vm7, 1.0, %v1424_v40  ;;  %v68_v43 = vpop.permute.xlu0 %67 }
  0x8b   :  { %1101 = vmatprep.mubr.msk.f32.mxu0 %vm129_vm6, %v955_v42  ;;  %vm86_vm8 = vcmp.eq.s32.totalorder %v954_v37, %v68_v43  ;;  %v35_v44 = vpop.permute.xlu1 %34 }
  0x8c   :  { %vm53_vm9 = vcmp.eq.s32.totalorder %v1532_v34, %v35_v44  ;;  %1102 = vmatmul.mubr.msk.f32.vlgmr.msra.gmra.mrb[0].mxu0 %vm129_vm6, %v956_v41  ;;  %v826_v44 = vld [vmem:[%s1713_s3] sm:$0xff] }
  0x8d   :  { %vm94_vm10 = vmor %vm53_vm9, %vm86_vm8  ;;  %1315 = vmatpush3.bf16.msra.mxu0 %v1527_v32 }
  0x8e   :  { %v957_v45 = vsel %vm94_vm10, 1.0, %v1424_v40  ;;  %v71_v46 = vpop.permute.xlu0 %70  ;;  %1316 = vmatprep.subr.bf16.mxu0 %v1423_v29 }
  0x8f   :  { %vm87_vm11 = vcmp.eq.s32.totalorder %v954_v37, %v71_v46  ;;  %v38_v47 = vpop.permute.xlu1 %37  ;;  %1104 = vmatprep.mubr.msk.f32.mxu0 %vm129_vm6, %v957_v45  ;;  %v827_v45 = vld [vmem:[%s1713_s3 + $0x8] sm:$0xff] }
  0x90   :  { %vm54_vm12 = vcmp.eq.s32.totalorder %v1532_v34, %v38_v47  ;;  %v1374_v46 = vpack.c.bf16 %v827_v45, %v826_v44  ;;  %v828_v47 = vld [vmem:[%s1713_s3 + $0x10] sm:$0xff] }
  0x91   :  { %vm95_vm13 = vmor %vm54_vm12, %vm87_vm11  ;;  %1318 = vmatpush3.bf16.msra.mxu0 %v1567_v63  ;;  %vm272_vm11 = vcmask 523264  }
  0x92   :  { %v958_v48 = vsel %vm95_vm13, 1.0, %v1424_v40  ;;  %v74_v49 = vpop.permute.xlu0 %73  ;;  %1319 = vmatprep.subr.bf16.mxu0 %v1423_v29  ;;  %vm912_vm13 = vcmp.lt.s32.totalorder %v1532_v34, 4 }
  0x93   :  { %vm88_vm14 = vcmp.eq.s32.totalorder %v954_v37, %v74_v49  ;;  %v41_v50 = vpop.permute.xlu1 %40  ;;  %1105 = vmatmul.mubr.msk.f32.gmra.mrb[2].mxu0 %vm129_vm6, %v958_v48  ;;  %v829_v48 = vld [vmem:[%s1713_s3 + $0x18] sm:$0xff] }
  0x94   :  { %vm55_vm15 = vcmp.eq.s32.totalorder %v1532_v34, %v41_v50  ;;  %v1377_v49 = vpack.c.bf16 %v829_v48, %v828_v47  ;;  %v830_v50 = vld [vmem:[%s1713_s3 + $0x20] sm:$0xff] }
  0x95   :  { %vm96_vm0 = vmor %vm55_vm15, %vm88_vm14  ;;  %1321 = vmatpush3.bf16.msra.mxu0 %v1578_v3  ;;  %vm934_vm15 = vcmask 7168  }
  0x96   :  { %v959_v51 = vsel %vm96_vm0, 1.0, %v1424_v40  ;;  %v77_v52 = vpop.permute.xlu0 %76  ;;  %1322 = vmatprep.subr.bf16.mxu0 %v1423_v29  ;;  %vm947_vm0 = vcmp.eq.s32.totalorder %v1532_v34, 4 }
  0x97   :  { %vm89_vm1 = vcmp.eq.s32.totalorder %v954_v37, %v77_v52  ;;  %v44_v53 = vpop.permute.xlu1 %43  ;;  %1107 = vmatprep.mubr.msk.f32.mxu0 %vm129_vm6, %v959_v51  ;;  %v831_v51 = vld [vmem:[%s1713_s3 + $0x28] sm:$0xff] }
  0x98   :  { %vm56_vm2 = vcmp.eq.s32.totalorder %v1532_v34, %v44_v53  ;;  %v1380_v52 = vpack.c.bf16 %v831_v51, %v830_v50  ;;  %v832_v53 = vld [vmem:[%s1713_s3 + $0x30] sm:$0xff] }
  0x99   :  { %vm97_vm3 = vmor %vm56_vm2, %vm89_vm1  ;;  %1324 = vmatpush3.bf16.msra.mxu0 %v1591_v6 }
  0x9a   :  { %v960_v54 = vsel %vm97_vm3, 1.0, %v1424_v40  ;;  %v80_v55 = vpop.permute.xlu0 %79  ;;  %1337 = vmatprep.subr.bf16.mxu0 %v1423_v29 }
  0x9b   :  { %vm90_vm4 = vcmp.eq.s32.totalorder %v954_v37, %v80_v55  ;;  %v47_v56 = vpop.permute.xlu1 %46  ;;  %1108 = vmatmul.mubr.msk.f32.gmra.mrb[4].mxu0 %vm129_vm6, %v960_v54  ;;  %v833_v54 = vld [vmem:[%s1713_s3 + $0x38] sm:$0xff] }
  0x9c   :  { %vm57_vm5 = vcmp.eq.s32.totalorder %v1532_v34, %v47_v56  ;;  %v1383_v55 = vpack.c.bf16 %v833_v54, %v832_v53  ;;  %v1426_v56 = vmov 2  }
  0x9d   :  { %vm98_vm7 = vmor %vm57_vm5, %vm90_vm4  ;;  %1398 = vset.pattern.permute.xlu0 %v1426_v56 }
  0x9e   :  { %v961_v57 = vsel %vm98_vm7, 1.0, %v1424_v40  ;;  %v83_v58 = vpop.permute.xlu0 %82  ;;  %926 = vperm.xlu0 %1398, %v1458_v2  }
  0x9f   :  { %vm91_vm8 = vcmp.eq.s32.totalorder %v954_v37, %v83_v58  ;;  %v50_v59 = vpop.permute.xlu1 %49  ;;  %1110 = vmatprep.mubr.msk.f32.mxu0 %vm129_vm6, %v961_v57 }
  0xa0   :  { %vm58_vm9 = vcmp.eq.s32.totalorder %v1532_v34, %v50_v59 }
  0xa1   :  { %vm99_vm10 = vmor %vm58_vm9, %vm91_vm8 }
  0xa2   :  { %v962_v60 = vsel %vm99_vm10, 1.0, %v1424_v40 }
  0xa3   :  { %1111 = vmatmul.mubr.msk.f32.gmra.mrb[6].mxu0 %vm129_vm6, %v962_v60  ;;  %vm1425_vm6 = vmmov 0   ;;  %v799_v60 = vshrl.u32 %v25_v33, 7 }
  0xa4   :  { %1129 = vmatprep.mubr.msk.f32.mxu1 %vm1425_vm6, %v1424_v40  ;;  %1167 = vmatprep.mubr.msk.f32.mxu0 %vm1425_vm6, %v1424_v40 }
  0xa5   :  { %vm800_vm12 = vcmp.lt.s32.totalorder %v799_v60, 4 }
  0xa6   :  { %v979_v61 = vsel %vm800_vm12, 1.0, %v1424_v40 }
 0x15f   :  { %v1103_v7 = vpop.f32.mrb[0].mxu0 }
 0x160   :  { %v224_v8 = vpop.f32.mrb[1].mxu0 }
 0x161   :  { %1399 = vtanh.f32 %v224_v8 }
 0x166   :  { %v1106_v9 = vpop.f32.mrb[2].mxu0 }
 0x167   :  { %v234_v10 = vpop.f32.mrb[3].mxu0 }
 0x16b   :  { %v1400_v11 = vpop.eup %1399 }
 0x16c   :  { %1130 = vmatmul.mubr.msk.f32.vlgmr.msra.gmra.mrb[0].mxu1 %vm272_vm11, %v1400_v11 }
 0x16d   :  { %1303 = vmatpush3.bf16.msra.mxu1 %v1527_v32  ;;  %1148 = vmatprep.mubr.msk.f32.mxu1 %vm1425_vm6, %v1424_v40 }
 0x16e   :  { %v1605_v12 = vpop.f32.mrb[4].mxu0  ;;  %1304 = vmatprep.subr.bf16.mxu1 %v1423_v29 }
 0x16f   :  { %v244_v13 = vpop.f32.mrb[5].mxu0 }
 0x171   :  { %1306 = vmatpush3.bf16.msra.mxu1 %v1567_v63 }
 0x172   :  { %1307 = vmatprep.subr.bf16.mxu1 %v1423_v29 }
 0x175   :  { %1309 = vmatpush3.bf16.msra.mxu1 %v1578_v3 }
 0x176   :  { %v1611_v14 = vpop.f32.mrb[6].mxu0  ;;  %1310 = vmatprep.subr.bf16.mxu1 %v1423_v29 }
 0x177   :  { %v1614_v15 = vpop.f32.mrb[7].mxu0 }
 0x179   :  { %1312 = vmatpush3.bf16.msra.mxu1 %v1591_v6 }
 0x17a   :  { %1325 = vmatprep.subr.bf16.mxu1 %v1423_v29 }
 0x23f   :  { %v342_v16 = vpop.f32.mrb[0].mxu1 }
 0x240   :  { %v346_v17 = vadd.f32 %v1103_v7, %v342_v16  ;;  %v1131_v18 = vpop.f32.mrb[1].mxu1 }
 0x242   :  { %1401 = vtanh.f32 %v346_v17 }
 0x24c   :  { %v1402_v19 = vpop.eup %1401 }
 0x24d   :  { %1149 = vmatmul.mubr.msk.f32.vlgmr.msra.gmra.mrb[2].mxu1 %vm272_vm11, %v1402_v19  ;;  %v980_v19 = vld [vmem:[%s1713_s3 + $0x40] ss:$0 sm:$0xff] }
 0x24e   :  { %1327 = vmatpush3.bf16.msra.mxu1 %v1527_v32  ;;  %1186 = vmatprep.mubr.msk.f32.mxu1 %vm1425_vm6, %v1424_v40 }
 0x24f   :  { %1328 = vmatprep.subr.bf16.mxu1 %v1423_v29 }
 0x252   :  { %1330 = vmatpush3.bf16.msra.mxu1 %v1567_v63 }
 0x253   :  { %1331 = vmatprep.subr.bf16.mxu1 %v1423_v29 }
 0x256   :  { %1333 = vmatpush3.bf16.msra.mxu1 %v1578_v3 }
 0x257   :  { %1334 = vmatprep.subr.bf16.mxu1 %v1423_v29 }
 0x25a   :  { %1336 = vmatpush3.bf16.msra.mxu1 %v1591_v6 }
 0x25b   :  { %1349 = vmatprep.subr.bf16.mxu1 %v1423_v29 }
 0x320   :  { %v417_v20 = vpop.f32.mrb[2].mxu1 }
 0x321   :  { %v421_v21 = vadd.f32 %v417_v20, %v234_v10  ;;  %v1150_v22 = vpop.f32.mrb[3].mxu1 }
 0x323   :  { %1403 = vtanh.f32 %v421_v21 }
 0x32d   :  { %v1404_v23 = vpop.eup %1403 }
 0x32e   :  { %1168 = vmatmul.mubr.msk.f32.vlgmr.msra.gmra.mrb[8].mxu0 %vm272_vm11, %v1404_v23  ;;  %v927_v23 = vpop.permute.xlu0 %926 }
 0x32f   :  { %1339 = vmatpush3.bf16.msra.mxu0 %v1527_v32  ;;  %1205 = vmatprep.mubr.msk.f32.mxu0 %vm1425_vm6, %v1424_v40  ;;  %vm928_vm14 = vcmp.eq.s32.totalorder %v1532_v34, %v927_v23 }
 0x330   :  { %1340 = vmatprep.subr.bf16.mxu0 %v1423_v29 }
 0x333   :  { %1342 = vmatpush3.bf16.msra.mxu0 %v1567_v63 }
 0x334   :  { %1343 = vmatprep.subr.bf16.mxu0 %v1423_v29 }
 0x337   :  { %1345 = vmatpush3.bf16.msra.mxu0 %v1578_v3 }
 0x338   :  { %1346 = vmatprep.subr.bf16.mxu0 %v1423_v29 }
 0x33b   :  { %1348 = vmatpush3.bf16.msra.mxu0 %v1591_v6 }
 0x33c   :  { %1361 = vmatprep.subr.bf16.mxu0 %v1423_v29 }
 0x401   :  { %v492_v24 = vpop.f32.mrb[8].mxu0 }
 0x402   :  { %v496_v25 = vadd.f32 %v1106_v9, %v492_v24  ;;  %v1169_v26 = vpop.f32.mrb[9].mxu0 }
 0x404   :  { %1405 = vtanh.f32 %v496_v25 }
 0x40e   :  { %v1406_v27 = vpop.eup %1405 }
 0x40f   :  { %1187 = vmatmul.mubr.msk.f32.vlgmr.msra.gmra.mrb[4].mxu1 %vm272_vm11, %v1406_v27 }
 0x410   :  { %1351 = vmatpush3.bf16.msra.mxu1 %v1527_v32  ;;  %1224 = vmatprep.mubr.msk.f32.mxu1 %vm1425_vm6, %v1424_v40 }
 0x411   :  { %1352 = vmatprep.subr.bf16.mxu1 %v1423_v29 }
 0x414   :  { %1354 = vmatpush3.bf16.msra.mxu1 %v1567_v63 }
 0x415   :  { %1355 = vmatprep.subr.bf16.mxu1 %v1423_v29 }
 0x418   :  { %1357 = vmatpush3.bf16.msra.mxu1 %v1578_v3 }
 0x419   :  { %1358 = vmatprep.subr.bf16.mxu1 %v1423_v29 }
 0x41c   :  { %1360 = vmatpush3.bf16.msra.mxu1 %v1591_v6 }
 0x41d   :  { %1373 = vmatprep.subr.bf16.mxu1 %v1423_v29 }
 0x4e2   :  { %v567_v28 = vpop.f32.mrb[4].mxu1 }
 0x4e3   :  { %v571_v30 = vadd.f32 %v567_v28, %v244_v13  ;;  %v1188_v31 = vpop.f32.mrb[5].mxu1 }
 0x4e5   :  { %1407 = vtanh.f32 %v571_v30 }
 0x4ef   :  { %v1408_v35 = vpop.eup %1407 }
 0x4f0   :  { %1206 = vmatmul.mubr.msk.f32.vlgmr.msra.gmra.mrb[10].mxu0 %vm272_vm11, %v1408_v35 }
 0x4f1   :  { %1363 = vmatpush3.bf16.msra.mxu0 %v1527_v32  ;;  %1243 = vmatprep.mubr.msk.f32.mxu0 %vm1425_vm6, %v1424_v40 }
 0x4f2   :  { %1364 = vmatprep.subr.bf16.mxu0 %v1423_v29 }
 0x4f5   :  { %1366 = vmatpush3.bf16.msra.mxu0 %v1567_v63 }
 0x4f6   :  { %1367 = vmatprep.subr.bf16.mxu0 %v1423_v29 }
 0x4f9   :  { %1369 = vmatpush3.bf16.msra.mxu0 %v1578_v3 }
 0x4fa   :  { %1370 = vmatprep.subr.bf16.mxu0 %v1423_v29 }
 0x4fd   :  { %1372 = vmatpush3.bf16.msra.mxu0 %v1591_v6 }
 0x5c3   :  { %v642_v36 = vpop.f32.mrb[10].mxu0 }
 0x5c4   :  { %v646_v37 = vadd.f32 %v1605_v12, %v642_v36  ;;  %v1207_v38 = vpop.f32.mrb[11].mxu0 }
 0x5c6   :  { %1409 = vtanh.f32 %v646_v37 }
 0x5d0   :  { %v1410_v32 = vpop.eup %1409 }
 0x5d1   :  { %1225 = vmatmul.mubr.msk.f32.vlgmr.msra.gmra.mrb[6].mxu1 %vm272_vm11, %v1410_v32 }
 0x5d2   :  { %1262 = vmatprep.mubr.msk.f32.mxu1 %vm1425_vm6, %v1424_v40  ;;  %1375 = vmatpush3.bf16.msra.mxu1 %v1374_v46 }
 0x5d3   :  { %1376 = vmatprep.subr.bf16.mxu1 %v1423_v29 }
 0x5d6   :  { %1378 = vmatpush3.bf16.msra.mxu1 %v1377_v49 }
 0x5d7   :  { %1379 = vmatprep.subr.bf16.mxu1 %v1423_v29 }
 0x5da   :  { %1381 = vmatpush3.bf16.msra.mxu1 %v1380_v52 }
 0x5db   :  { %1382 = vmatprep.subr.bf16.mxu1 %v1423_v29 }
 0x5de   :  { %1384 = vmatpush3.bf16.msra.mxu1 %v1383_v55 }
 0x6a4   :  { %v717_v39 = vpop.f32.mrb[6].mxu1 }
 0x6a5   :  { %v721_v41 = vadd.f32 %v717_v39, %v1614_v15  ;;  %v1226_v42 = vpop.f32.mrb[7].mxu1 }
 0x6a7   :  { %1411 = vtanh.f32 %v721_v41 }
 0x6b1   :  { %v1412_v43 = vpop.eup %1411 }
 0x6b2   :  { %1244 = vmatmul.mubr.msk.f32.vlgmr.msra.gmra.mrb[12].mxu0 %vm272_vm11, %v1412_v43 }
 0x785   :  { %v792_v57 = vpop.f32.mrb[12].mxu0 }
 0x786   :  { %v796_v58 = vadd.f32 %v1611_v14, %v792_v57  ;;  %v1245_v59 = vpop.f32.mrb[13].mxu0 }
 0x788   :  { %1413 = vtanh.f32 %v796_v58 }
 0x792   :  { %v1414_v62 = vpop.eup %1413 }
 0x793   :  { %v803_v63 = vmul.f32 %v1414_v62, %v979_v61 }
 0x795   :  { %v804_v0 = vsel %vm272_vm11, %v803_v63, 0.0 }
 0x796   :  { %v805_v29 = vrot.slane %v804_v0, 4 }
 0x798   :  { %v806_v1 = vadd.f32 %v805_v29, %v804_v0 }
 0x79a   :  { %v807_v3 = vrot.slane %v806_v1, 2 }
 0x79c   :  { %v808_v4 = vadd.f32 %v807_v3, %v806_v1 }
 0x79e   :  { %v809_v5 = vrot.slane %v808_v4, 1 }
 0x7a0   :  { %v810_v2 = vadd.f32 %v809_v5, %v808_v4 }
 0x7a2   :  { %v811_v6 = vmul.f32 0.25, %v810_v2 }
 0x7a4   :  { %v812_v7 = vsub.f32 %v1414_v62, %v811_v6 }
 0x7a6   :  { %v813_v8 = vmul.f32 %v812_v7, %v812_v7 }
 0x7a8   :  { %v814_v9 = vmul.f32 %v979_v61, %v813_v8 }
 0x7aa   :  { %v815_v10 = vsel %vm272_vm11, %v814_v9, 0.0 }
 0x7ab   :  { %v816_v33 = vrot.slane %v815_v10, 4 }
 0x7ad   :  { %v817_v11 = vadd.f32 %v816_v33, %v815_v10 }
 0x7af   :  { %v818_v12 = vrot.slane %v817_v11, 2 }
 0x7b1   :  { %v819_v40 = vadd.f32 %v818_v12, %v817_v11 }
 0x7b3   :  { %v820_v13 = vrot.slane %v819_v40, 1 }
 0x7b5   :  { %v821_v14 = vadd.f32 %v820_v13, %v819_v40 }
 0x7b7   :  { %v822_v15 = vmul.f32 0.25, %v821_v14 }
 0x7b9   :  { %v823_v16 = vadd.f32 1e-05, %v822_v15 }
 0x7bb   :  { %1415 = vrsqrt.f32 %v823_v16 }
 0x7c5   :  { %v1416_v17 = vpop.eup %1415 }
 0x7c6   :  { %v825_v18 = vmul.f32 %v1416_v17, %v812_v7 }
 0x7c8   :  { %1263 = vmatmul.mubr.msk.f32.vlgmr.msra.gmra.mrb[8].mxu1 %vm272_vm11, %v825_v18 }
 0x89b   :  { %v908_v20 = vpop.f32.mrb[8].mxu1 }
 0x89c   :  { %v909_v21 = vadd.f32 %v980_v19, %v908_v20  ;;  %v1264_v22 = vpop.f32.mrb[9].mxu1 }
 0x89e   :  { %v913_v24 = vsel %vm912_vm13, %v909_v21, -1e+30  ;;  %v929_v25 = vsel %vm928_vm14, %v909_v21, 0.0 }
 0x89f   :  { %914 = vmax.xlane.f32.xlu1 %v913_v24 }
 0x8a3   :  { %930 = vadd.xlane.f32.xlu1 %v929_v25 }
 0x92c   :  { %v915_v26 = vpop.xlane.xlu1 %914 }
 0x92d   :  { %v916_v27 = vsub.f32 %v913_v24, %v915_v26 }
 0x92f   :  { %v917_v28 = vmul.f32 1.442695, %v916_v27 }
 0x930   :  { %v931_v38 = vpop.xlane.xlu1 %930 }
 0x931   :  { %1417 = vpow2.f32 %v917_v28 }
 0x93b   :  { %v1418_v30 = vpop.eup %1417 }
 0x93c   :  { %919 = vadd.xlane.f32.xlu0 %v1418_v30 }
 0x9c9   :  { %v920_v31 = vpop.xlane.xlu0 %919 }
 0x9ca   :  { %1419 = vlog2.f32 %v920_v31 }
 0x9d4   :  { %v1420_v35 = vpop.eup %1419 }
 0x9d5   :  { %v922_v36 = vmul.f32 0.6931472, %v1420_v35 }
 0x9d7   :  { %v923_v37 = vadd.f32 %v922_v36, %v915_v26 }
 0x9d9   :  { %v932_v32 = vsub.f32 %v923_v37, %v931_v38 }
 0x9db   :  { %v933_v39 = vmul.f32 %v979_v61, %v932_v32 }
 0x9dd   :  { %v935_v41 = vsel %vm934_vm15, %v933_v39, 0.0 }
 0x9de   :  { %936 = vadd.xlane.f32.xlu1 %v935_v41 }
 0xa6b   :  { %v937_v42 = vpop.xlane.xlu1 %936 }
 0xa6c   :  { %v938_v43 = vrot.slane %v937_v42, 4 }
 0xa6e   :  { %v939_v44 = vadd.f32 %v938_v43, %v937_v42 }
 0xa70   :  { %v940_v45 = vrot.slane %v939_v44, 2 }
 0xa72   :  { %v941_v46 = vadd.f32 %v940_v45, %v939_v44 }
 0xa74   :  { %v942_v47 = vrot.slane %v941_v46, 1 }
 0xa76   :  { %v943_v48 = vadd.f32 %v942_v47, %v941_v46 }
 0xa78   :  { %1385 = vpush %v943_v48 }
 0xaa9   :  { %s1386_s3 = spop %1385 }
 0xaaa   :  { %v945_v49 = vstv %s1386_s3 }
 0xaab   :  { %v946_v50 = vmul.f32 0.25, %v945_v49 }
 0xaad   :  { %v948_v51 = vsel %vm947_vm0, %v946_v50, %v909_v21 }
 0xaae   :  { %949 = vst [vmem:[%s1714_s4] sm:$0xff] %v948_v51 }

</bundles_post_ra>
